<compile_context>
chip_gen: v6e
topology: v6e:2x2x1
jax: 0.10.0
libtpu: 0.0.40
codegen_flags: <defaults>
</compile_context>

<pallas_src>
import jax
import jax.numpy as jnp
from jax.experimental import pallas as pl
from jax.experimental.pallas import tpu as pltpu

SEQ = 60        # fixed by nn.Linear(60, 1)
OUT_DIM = 200   # fixed by nn.Linear(hidden_size, 200)
OUT_PAD = 256   # lane-dense (multiple of 128) output width


def classifier_kernel(embeds_ref, w1_ref, b1_ref, w2_ref, b2_ref, out_ref):
    # embeds_ref: (TB, S, H) native dtype     w1_ref: (1, S, H) f32 (pre-broadcast)
    # b1_ref:     (1,) f32 in SMEM            w2_ref: (H, 256) f32 or bf16
    # b2_ref:     (1, 256) f32                out_ref: (TB, 256) f32
    # dense1 along S: feats[b, h] = sum_s e[b, s, h] * w1[s] + b1
    prod = embeds_ref[...].astype(jnp.float32) * w1_ref[...]        # (TB, S, H) f32
    feats = jnp.sum(prod, axis=1) + b1_ref[0]                       # (TB, H)
    feats = jnp.maximum(feats, 0.0)                                 # ReLU
    # dense2: (TB, H) @ (H, 256) on the MXU, f32 accumulate
    out = jnp.dot(feats.astype(w2_ref.dtype), w2_ref[...],
                  preferred_element_type=jnp.float32)
    out_ref[...] = out + b2_ref[...]


def _vmem_limit_bytes():
    """Generation-aware scoped-VMEM limit with headroom (fallback: 56 MiB)."""
    cap = 64 * 1024 * 1024
    try:
        cap = int(getattr(pltpu.get_tpu_info(), "vmem_capacity_bytes", cap))
    except Exception:
        pass
    return min(cap - cap // 8, 100 * 1024 * 1024)   # 128MiB->100MiB, 64MiB->56MiB


def _pick_batch_tile(B, H, in_itemsize, w2_itemsize, budget):
    """Batch tile sized from the f32 working set (2x streamed block + f32 temps)."""
    # per batch-row: 2x input block (double buffer) + ~2x f32 temps + 2x out block
    per_row = SEQ * H * (2 * in_itemsize + 2 * 4) + 2 * OUT_PAD * 4
    resident = H * OUT_PAD * w2_itemsize + SEQ * H * 4 + OUT_PAD * 4
    avail = max(budget - resident, per_row)
    max_tb = max(1, avail // per_row)

    if B <= max_tb:
        if B >= 16:
            # whole batch fits, but keep >=2 grid steps so v7x uses both cores
            return max(8, (pl.cdiv(B, 2) // 8) * 8)
        return B                                   # tiny batch: single step
    # multi-step: largest block the budget allows, MXU/sublane aligned
    if max_tb >= 128:
        tb = (max_tb // 128) * 128
    else:
        # TODO(synk): if even 8 rows overshoot (huge H), H-tiling would be needed.
        tb = max(8, (max_tb // 8) * 8)
    return min(tb, B)


def prepare_params(w1, b1, w2, b2, *, activation_dtype=jnp.float32):
    """One-time weight preprocessing (hoisted out of the per-call path).

    w1: (1, 60); b1: (1,); w2: (200, H); b2: (200,).
    """
    H = w2.shape[1]
    mm_dtype = (jnp.bfloat16 if jnp.dtype(activation_dtype) == jnp.bfloat16
                else jnp.float32)
    w1_k = jnp.broadcast_to(w1.reshape(1, SEQ, 1).astype(jnp.float32), (1, SEQ, H))
    b1_k = b1.reshape(1).astype(jnp.float32)
    w2_k = jnp.pad(w2.T.astype(mm_dtype), ((0, 0), (0, OUT_PAD - OUT_DIM)))
    b2_k = jnp.pad(b2.reshape(1, OUT_DIM).astype(jnp.float32),
                   ((0, 0), (0, OUT_PAD - OUT_DIM)))
    return w1_k, b1_k, w2_k, b2_k


def classifier_apply(embeds, w1_k, b1_k, w2_k, b2_k):
    """embeds: (B, 60, H). Returns (B, 200) float32."""
    B, S, H = embeds.shape
    assert S == SEQ and w2_k.shape == (H, OUT_PAD)
    in_itemsize = jnp.dtype(embeds.dtype).itemsize
    w2_itemsize = jnp.dtype(w2_k.dtype).itemsize

    vmem_limit = _vmem_limit_bytes()
    tb = _pick_batch_tile(B, H, in_itemsize, w2_itemsize,
                          budget=vmem_limit - 8 * 1024 * 1024)
    grid = (pl.cdiv(B, tb),)     # no wrapper pad: ragged last block is masked

    cost = pl.CostEstimate(
        flops=2 * B * H * (SEQ + OUT_PAD),
        transcendentals=0,
        bytes_accessed=(B * SEQ * H * in_itemsize            # embeds stream
                        + SEQ * H * 4                        # w1 (broadcast)
                        + H * OUT_PAD * w2_itemsize + OUT_PAD * 4
                        + B * OUT_PAD * 4),
    )

    out = pl.pallas_call(
        classifier_kernel,
        out_shape=jax.ShapeDtypeStruct((B, OUT_PAD), jnp.float32),
        grid=grid,
        in_specs=[
            pl.BlockSpec((tb, SEQ, H), lambda i: (i, 0, 0)),        # embeds: streamed
            pl.BlockSpec((1, SEQ, H), lambda i: (0, 0, 0)),         # w1: resident
            pl.BlockSpec(memory_space=pltpu.MemorySpace.SMEM),      # b1: scalar in SMEM
            pl.BlockSpec((H, OUT_PAD), lambda i: (0, 0)),           # w2: resident
            pl.BlockSpec((1, OUT_PAD), lambda i: (0, 0)),           # b2: resident
        ],
        out_specs=pl.BlockSpec((tb, OUT_PAD), lambda i: (i, 0)),
        compiler_params=pltpu.CompilerParams(
            dimension_semantics=("parallel",),
            vmem_limit_bytes=vmem_limit),
        cost_estimate=cost,
    )(embeds, w1_k, b1_k, w2_k, b2_k)

    return out[:, :OUT_DIM]


def classifier_forward(embeds, w1, b1, w2, b2):
    """Convenience wrapper: prepare params + apply (prefer calling prepare once)."""
    params = prepare_params(w1, b1, w2, b2, activation_dtype=embeds.dtype)
    return classifier_apply(embeds, *params)


def classifier_reference(embeds, w1, b1, w2, b2):
    """Pure-JAX reference mirroring the PyTorch forward (B > 1 so squeeze -> (B, H))."""
    image_embeds = jnp.swapaxes(embeds.astype(jnp.float32), 1, 2)   # (B, H, 60)
    feats = jnp.squeeze(image_embeds @ w1.T + b1, axis=-1)          # (B, H)
    feats = jnp.maximum(feats, 0.0)
    return feats @ w2.T + b2                                        # (B, 200)


if __name__ == "__main__":
    HIDDEN = 32   # small hidden_size; S=60 and out=200 are fixed by the module

    key = jax.random.PRNGKey(0)
    k_e, k_w1, k_b1, k_w2, k_b2, k_e2 = jax.random.split(key, 6)

    # PyTorch parameter shapes: dense1 (1, 60)/(1,), dense2 (200, H)/(200,)
    w1 = jax.random.normal(k_w1, (1, SEQ), dtype=jnp.float32) * 0.1
    b1 = jax.random.normal(k_b1, (1,), dtype=jnp.float32) * 0.1
    w2 = jax.random.normal(k_w2, (OUT_DIM, HIDDEN), dtype=jnp.float32) * 0.1
    b2 = jax.random.normal(k_b2, (OUT_DIM,), dtype=jnp.float32) * 0.1

    # --- test 1: f32 activations, batch fits in one block --------------------
    B1 = 4
    embeds = jax.random.normal(k_e, (B1, SEQ, HIDDEN), dtype=jnp.float32)
    out = jax.block_until_ready(classifier_forward(embeds, w1, b1, w2, b2))
    ref = classifier_reference(embeds, w1, b1, w2, b2)
    assert out.shape == (B1, OUT_DIM)
    assert jnp.allclose(out, ref, atol=1e-4, rtol=1e-4), "f32 mismatch vs reference"

    # --- test 2: bf16 activations, B not a multiple of TB (ragged last block) -
    B2 = 20
    embeds2 = (jax.random.normal(k_e2, (B2, SEQ, HIDDEN), dtype=jnp.float32)
               .astype(jnp.bfloat16))
    out2 = jax.block_until_ready(classifier_forward(embeds2, w1, b1, w2, b2))
    ref2 = classifier_reference(embeds2, w1, b1, w2, b2)
    assert out2.shape == (B2, OUT_DIM)
    assert jnp.allclose(out2, ref2, atol=5e-2, rtol=5e-2), "bf16 mismatch vs reference"

    # TODO(synk): F.normalize(feats) in the original forward is dead code (not returned); skipped.
    print("KERNEL_OK")
</pallas_src>

<mosaic_0001>
module attributes {stable_mosaic.version = 11 : i64} {
  func.func @classifier_kernel(%arg0: i32, %arg1: memref<4x60x32xf32, #tpu.memory_space<vmem>>, %arg2: memref<1x60x32xf32, #tpu.memory_space<vmem>>, %arg3: memref<1xf32, #tpu.memory_space<smem>>, %arg4: memref<32x256xf32, #tpu.memory_space<vmem>>, %arg5: memref<1x256xf32, #tpu.memory_space<vmem>>, %arg6: memref<4x256xf32, #tpu.memory_space<vmem>>) attributes {dimension_semantics = [#tpu.dimension_semantics<parallel>], iteration_bounds = array<i64: 1>, scalar_prefetch = 0 : i64, scratch_operands = 0 : i64, tpu.core_type = #tpu.core_type<tc>, window_params = [{transform_indices = @transform_0, window_bounds = array<i64: 4, 60, 32>}, {pipeline_mode = #tpu.pipeline_mode<synchronous>, transform_indices = @transform_1, window_bounds = array<i64: 1, 60, 32>}, {transform_indices = @transform_2, window_bounds = array<i64: 1>}, {pipeline_mode = #tpu.pipeline_mode<synchronous>, transform_indices = @transform_3, window_bounds = array<i64: 32, 256>}, {pipeline_mode = #tpu.pipeline_mode<synchronous>, transform_indices = @transform_4, window_bounds = array<i64: 1, 256>}, {transform_indices = @transform_5, window_bounds = array<i64: 4, 256>}]} {
    %c0 = arith.constant 0 : index
    %c0_0 = arith.constant 0 : index
    %c0_1 = arith.constant 0 : index
    %0 = vector.load %arg1[%c0, %c0_0, %c0_1] : memref<4x60x32xf32, #tpu.memory_space<vmem>>, vector<4x60x32xf32>
    %c0_2 = arith.constant 0 : index
    %c0_3 = arith.constant 0 : index
    %c0_4 = arith.constant 0 : index
    %1 = vector.load %arg2[%c0_2, %c0_3, %c0_4] : memref<1x60x32xf32, #tpu.memory_space<vmem>>, vector<1x60x32xf32>
    %2 = vector.broadcast %1 : vector<1x60x32xf32> to vector<4x60x32xf32>
    %3 = arith.mulf %0, %2 : vector<4x60x32xf32>
    %cst = arith.constant dense<0.000000e+00> : vector<4x32xf32>
    %4 = vector.multi_reduction <add>, %3, %cst [1] : vector<4x60x32xf32> to vector<4x32xf32>
    %c0_5 = arith.constant 0 : index
    %5 = memref.load %arg3[%c0_5] : memref<1xf32, #tpu.memory_space<smem>>
    %6 = vector.broadcast %5 : f32 to vector<4x32xf32>
    %7 = arith.addf %4, %6 : vector<4x32xf32>
    %cst_6 = arith.constant 0.000000e+00 : f32
    %8 = vector.broadcast %cst_6 : f32 to vector<4x32xf32>
    %9 = arith.maximumf %7, %8 : vector<4x32xf32>
    %c0_7 = arith.constant 0 : index
    %c0_8 = arith.constant 0 : index
    %10 = vector.load %arg4[%c0_7, %c0_8] : memref<32x256xf32, #tpu.memory_space<vmem>>, vector<32x256xf32>
    %cst_9 = arith.constant dense<0.000000e+00> : vector<4x256xf32>
    %11 = tpu.matmul %9, %10, %cst_9 {dimension_numbers = #tpu.dot_dimension_numbers<[1], [0], [0], [1], [0, 0, 1, 1], [], []>} : vector<4x32xf32>, vector<32x256xf32>, vector<4x256xf32> -> vector<4x256xf32>
    %c0_10 = arith.constant 0 : index
    %c0_11 = arith.constant 0 : index
    %12 = vector.load %arg5[%c0_10, %c0_11] : memref<1x256xf32, #tpu.memory_space<vmem>>, vector<1x256xf32>
    %13 = vector.broadcast %12 : vector<1x256xf32> to vector<4x256xf32>
    %14 = arith.addf %11, %13 : vector<4x256xf32>
    %c0_12 = arith.constant 0 : index
    %c0_13 = arith.constant 0 : index
    %15 = vector.load %arg6[%c0_12, %c0_13] : memref<4x256xf32, #tpu.memory_space<vmem>>, vector<4x256xf32>
    tpu.vector_store %arg6[%c0_12, %c0_13], %14 {strides = array<i32>} : memref<4x256xf32, #tpu.memory_space<vmem>>, vector<4x256xf32>,
    return
  }
  func.func @transform_0(%arg0: i32) -> (i32, i32, i32) {
    %c0_i32 = arith.constant 0 : i32
    %c0_i32_0 = arith.constant 0 : i32
    %c0_i32_1 = arith.constant 0 : i32
    return %arg0, %c0_i32, %c0_i32_0 : i32, i32, i32
  }
  func.func @transform_1(%arg0: i32) -> (i32, i32, i32) {
    %c0_i32 = arith.constant 0 : i32
    %c0_i32_0 = arith.constant 0 : i32
    %c0_i32_1 = arith.constant 0 : i32
    %c0_i32_2 = arith.constant 0 : i32
    return %c0_i32, %c0_i32_0, %c0_i32_1 : i32, i32, i32
  }
  func.func @transform_2(%arg0: i32) -> i32 {
    %c0_i32 = arith.constant 0 : i32
    %c0_i32_0 = arith.constant 0 : i32
    return %c0_i32 : i32
  }
  func.func @transform_3(%arg0: i32) -> (i32, i32) {
    %c0_i32 = arith.constant 0 : i32
    %c0_i32_0 = arith.constant 0 : i32
    %c0_i32_1 = arith.constant 0 : i32
    return %c0_i32, %c0_i32_0 : i32, i32
  }
  func.func @transform_4(%arg0: i32) -> (i32, i32) {
    %c0_i32 = arith.constant 0 : i32
    %c0_i32_0 = arith.constant 0 : i32
    %c0_i32_1 = arith.constant 0 : i32
    return %c0_i32, %c0_i32_0 : i32, i32
  }
  func.func @transform_5(%arg0: i32) -> (i32, i32) {
    %c0_i32 = arith.constant 0 : i32
    %c0_i32_0 = arith.constant 0 : i32
    return %arg0, %c0_i32 : i32, i32
  }
}

</mosaic_0001>

<bundles_post_ra>
// kernel: tpu_custom_call.1
= control target key start
LH: loop header
LB: loop body
LE: loop exit
PB: predicated region body
PF: predicated region fallthrough
CT: control target
= control target key end

     0   :  { %v337_v4 = vmov 0.0   ;;  %vm94_vm0 = vcmask 261120   ;;  %s576_s0 = inlined_call_operand.vmem [shape: f32[4,60,32], index: 0, kind: input, shape index: {}]   ;;  %s577_s1 = inlined_call_operand.vmem [shape: f32[1,60,32], index: 1, kind: input, shape index: {}]   ;;  %s578_s2 = inlined_call_operand.<no memory space> [shape: f32[1], index: 2, kind: input, shape index: {}]   ;;  %s579_s3 = inlined_call_operand.vmem [shape: f32[32,256], index: 3, kind: input, shape index: {}]   ;;  %s580_s4 = inlined_call_operand.vmem [shape: f32[1,256], index: 4, kind: input, shape index: {}]   ;;  %s581_s5 = inlined_call_operand.hbm [shape: f32[4,256], index: 5, kind: output, shape index: {}]  }
   0x1   :  { %v197_v0 = vld [vmem:[%s579_s3 + $0x38] sm:$0xff]  ;;  %v196_v1 = vld [vmem:[%s579_s3 + $0x30] sm:$0xff]  ;;  %v195_v2 = vld [vmem:[%s579_s3 + $0x28] sm:$0xff]  ;;  %286 = vmatprep.mubr.f32.mxu0 %v337_v4 }
   0x2   :  { %246 = vmatprep.subr.mxu0 %v197_v0  ;;  %v194_v3 = vld [vmem:[%s579_s3 + $0x20] sm:$0xff]  ;;  %v193_v5 = vld [vmem:[%s579_s3 + $0x18] sm:$0xff]  ;;  %v192_v6 = vld [vmem:[%s579_s3 + $0x10] sm:$0xff] }
   0x3   :  { %247 = vmatpush1.msra.mxu0 %v196_v1  ;;  %v191_v7 = vld [vmem:[%s579_s3 + $0x8] sm:$0xff]  ;;  %v190_v8 = vld [vmem:[%s579_s3] sm:$0xff]  ;;  %v24_v11 = vld [vmem:[%s576_s0 + $0x10] sm:$0xff] }
   0x4   :  { %248 = vmatprep.subr.mxu0 %v195_v2  ;;  %v22_v9 = vld [vmem:[%s576_s0] sm:$0xff]  ;;  %v23_v10 = vld [vmem:[%s576_s0 + $0x8] sm:$0xff]  ;;  %v25_v12 = vld [vmem:[%s576_s0 + $0x18] sm:$0xff] }
   0x5   :  { %249 = vmatpush1.msra.mxu0 %v194_v3  ;;  %v26_v13 = vld [vmem:[%s576_s0 + $0x20] sm:$0xff]  ;;  %v31_v15 = vld [vmem:[%s576_s0 + $0x48] sm:$0xff]  ;;  %v28_v17 = vld [vmem:[%s576_s0 + $0x30] sm:$0xff] }
   0x6   :  { %250 = vmatprep.subr.mxu0 %v193_v5  ;;  %v30_v14 = vld [vmem:[%s576_s0 + $0x40] sm:$0xff]  ;;  %v27_v16 = vld [vmem:[%s576_s0 + $0x28] sm:$0xff]  ;;  %v29_v18 = vld [vmem:[%s576_s0 + $0x38] sm:$0xf] }
   0x7   :  { %251 = vmatpush1.msra.mxu0 %v192_v6  ;;  %v32_v19 = vld [vmem:[%s576_s0 + $0x50] sm:$0xff]  ;;  %v54_v20 = vld [vmem:[%s577_s1] sm:$0xff]  ;;  %v55_v21 = vld [vmem:[%s577_s1 + $0x8] sm:$0xff] }
   0x8   :  { %252 = vmatprep.subr.mxu0 %v191_v7  ;;  %v33_v22 = vld [vmem:[%s576_s0 + $0x58] sm:$0xff]  ;;  %v34_v23 = vld [vmem:[%s576_s0 + $0x60] sm:$0xff]  ;;  %v35_v24 = vld [vmem:[%s576_s0 + $0x68] sm:$0xff]  ;;  %v62_v34 = vmul.f32 %v54_v20, %v22_v9  ;;  %v63_v35 = vmul.f32 %v55_v21, %v23_v10  ;;  %v70_v36 = vmul.f32 %v54_v20, %v30_v14 }
   0x9   :  { %253 = vmatpush1.msra.mxu0 %v190_v8  ;;  %v36_v25 = vld [vmem:[%s576_s0 + $0x70] sm:$0xff]  ;;  %v57_v27 = vld [vmem:[%s577_s1 + $0x18] sm:$0xff]  ;;  %v58_v28 = vld [vmem:[%s577_s1 + $0x20] sm:$0xff] }
   0xa   :  { %v56_v26 = vld [vmem:[%s577_s1 + $0x10] sm:$0xff]  ;;  %v59_v29 = vld [vmem:[%s577_s1 + $0x28] sm:$0xff]  ;;  %v464_v31 = vld [vmem:[%s577_s1 + $0x38] sm:$0xf] }
   0xb   :  { %v459_v30 = vld [vmem:[%s577_s1 + $0x30] sm:$0xff]  ;;  %v37_v32 = vld [vmem:[%s576_s0 + $0x78] sm:$0xf]  ;;  %v38_v33 = vld [vmem:[%s576_s0 + $0x80] sm:$0xff] }
   0xc   :  { %11 = vsyncpa [#allocation4], 0  ;;  %v39_v37 = vld [vmem:[%s576_s0 + $0x88] sm:$0xff]  ;;  %v40_v38 = vld [vmem:[%s576_s0 + $0x90] sm:$0xff]  ;;  %v64_v40 = vmul.f32 %v56_v26, %v24_v11  ;;  %v65_v41 = vmul.f32 %v57_v27, %v25_v12  ;;  %v66_v42 = vmul.f32 %v58_v28, %v26_v13  ;;  %v71_v43 = vmul.f32 %v55_v21, %v31_v15  ;;  %s338_s11 = smov [#allocation3]  }
   0xd   :  { %v41_v39 = vld [vmem:[%s576_s0 + $0x98] sm:$0xff]  ;;  %v42_v44 = vld [vmem:[%s576_s0 + $0xa0] sm:$0xff]  ;;  %v43_v45 = vld [vmem:[%s576_s0 + $0xa8] sm:$0xff]  ;;  %v67_v47 = vmul.f32 %v59_v29, %v27_v16  ;;  %v68_v48 = vmul.f32 %v459_v30, %v28_v17  ;;  %v492_v49 = vmul.f32 %v464_v31, %v29_v18  ;;  %v72_v50 = vmul.f32 %v56_v26, %v32_v19  ;;  %s304_s12 = sshll.u32 %s338_s11, 4  ;;  %s305_s12 = int_to_ptr.vmem [resolvable:$true] %s304_s12 }
   0xe   :  { %v44_v46 = vld [vmem:[%s576_s0 + $0xb0] sm:$0xff]  ;;  %v45_v51 = vld [vmem:[%s576_s0 + $0xb8] sm:$0xf]  ;;  %v73_v52 = vmul.f32 %v57_v27, %v33_v22  ;;  %v74_v53 = vmul.f32 %v58_v28, %v34_v23  ;;  %v75_v54 = vmul.f32 %v59_v29, %v35_v24  ;;  %v76_v55 = vmul.f32 %v459_v30, %v36_v25  ;;  %v46_v56 = vld [vmem:[%s576_s0 + $0xc0] sm:$0xff]  ;;  %s315_s13 = scalar_lea.vmem %s305_s12, 128  ;;  %p320_p1 = scmp.lt.s32.totalorder %s305_s12, %s305_s12 }
   0xf   :  { %v47_v57 = vld [vmem:[%s576_s0 + $0xc8] sm:$0xff]  ;;  %v48_v58 = vld [vmem:[%s576_s0 + $0xd0] sm:$0xff]  ;;  %v508_v59 = vmul.f32 %v464_v31, %v37_v32  ;;  %v78_v60 = vmul.f32 %v54_v20, %v38_v33  ;;  %v79_v61 = vmul.f32 %v55_v21, %v39_v37  ;;  %v80_v62 = vmul.f32 %v56_v26, %v40_v38  ;;  %v49_v3 = vld [vmem:[%s576_s0 + $0xd8] sm:$0xff]  ;;  %p316_p0 = scmp.ne.s32.totalorder %s305_s12, %s315_s13  ;;  %p321_p2 = scmp.lt.s32.totalorder %s315_s13, %s315_s13 }
  0x10   :  { %v81_v63 = vmul.f32 %v57_v27, %v41_v39  ;;  %v82_v0 = vmul.f32 %v58_v28, %v42_v44  ;;  %v83_v1 = vmul.f32 %v59_v29, %v43_v45  ;;  %v84_v2 = vmul.f32 %v459_v30, %v44_v46  ;;  %v50_v4 = vld [vmem:[%s576_s0 + $0xe0] sm:$0xff]  ;;  %v51_v9 = vld [vmem:[%s576_s0 + $0xe8] sm:$0xff]  ;;  %v52_v44 = vld [vmem:[%s576_s0 + $0xf0] sm:$0xff] }
  0x11   :  { %vm108_vm1 = vcmask 257024   ;;  %v518_v5 = vmul.f32 %v464_v31, %v45_v51  ;;  %v95_v6 = vsel %vm94_vm0, %v62_v34, 0.0  ;;  %v96_v7 = vsel %vm94_vm0, %v63_v35, 0.0  ;;  %p322_p3 = por %p321_p2, %p320_p1 }
  0x12   :  { %v98_v8 = vsel %vm94_vm0, %v64_v40, 0.0  ;;  %v86_v10 = vmul.f32 %v54_v20, %v46_v56  ;;  %v87_v11 = vmul.f32 %v55_v21, %v47_v57  ;;  %v88_v12 = vmul.f32 %v56_v26, %v48_v58 }
  0x13   :  { %v97_v13 = vadd.f32 %v96_v7, %v95_v6  ;;  %v100_v14 = vsel %vm94_vm0, %v65_v41, 0.0  ;;  %v117_v15 = vsel %vm94_vm0, %v70_v36, 0.0  ;;  %v118_v16 = vsel %vm94_vm0, %v71_v43, 0.0  ;;  %p323_p4 = pnand %p322_p3, %p316_p0 }
  0x14   :  { %v120_v17 = vsel %vm94_vm0, %v72_v50, 0.0  ;;  %v89_v18 = vmul.f32 %v57_v27, %v49_v3  ;;  %v90_v19 = vmul.f32 %v58_v28, %v50_v4  ;;  %v119_v23 = vadd.f32 %v118_v16, %v117_v15 }
  0x15   :  { %v99_v22 = vadd.f32 %v98_v8, %v97_v13  ;;  %v91_v24 = vmul.f32 %v59_v29, %v51_v9  ;;  %v102_v25 = vsel %vm94_vm0, %v66_v42, 0.0  ;;  %v122_v20 = vsel %vm94_vm0, %v73_v52, 0.0 }
  0x16   :  { %v138_v21 = vsel %vm94_vm0, %v78_v60, 0.0  ;;  %v121_v32 = vadd.f32 %v120_v17, %v119_v23  ;;  %v139_v33 = vsel %vm94_vm0, %v79_v61, 0.0  ;;  %v141_v34 = vsel %vm94_vm0, %v80_v62, 0.0 }
  0x17   :  { %v101_v26 = vadd.f32 %v100_v14, %v99_v22  ;;  %v104_v35 = vsel %vm94_vm0, %v67_v47, 0.0  ;;  %v106_v27 = vsel %vm94_vm0, %v68_v48, 0.0  ;;  %v124_v28 = vsel %vm94_vm0, %v74_v53, 0.0 }
  0x18   :  { %v140_v36 = vadd.f32 %v139_v33, %v138_v21  ;;  %v123_v37 = vadd.f32 %v122_v20, %v121_v32  ;;  %v126_v38 = vsel %vm94_vm0, %v75_v54, 0.0  ;;  %v143_v39 = vsel %vm94_vm0, %v81_v63, 0.0  ;;  %v53_v54 = vld [vmem:[%s576_s0 + $0xf8] sm:$0xf] }
  0x19   :  { %v103_v29 = vadd.f32 %v102_v25, %v101_v26  ;;  %v159_v41 = vsel %vm94_vm0, %v86_v10, 0.0  ;;  %v160_v42 = vsel %vm94_vm0, %v87_v11, 0.0  ;;  %v162_v43 = vsel %vm94_vm0, %v88_v12, 0.0 }
  0x1a   :  { %v142_v40 = vadd.f32 %v141_v34, %v140_v36  ;;  %v125_v46 = vadd.f32 %v124_v28, %v123_v37  ;;  %v145_v47 = vsel %vm94_vm0, %v82_v0, 0.0  ;;  %v161_v48 = vadd.f32 %v160_v42, %v159_v41 }
  0x1b   :  { %v105_v45 = vadd.f32 %v104_v35, %v103_v29  ;;  %v109_v50 = vsel %vm108_vm1, %v492_v49, 0.0  ;;  %v128_v51 = vsel %vm94_vm0, %v76_v55, 0.0  ;;  %v164_v53 = vsel %vm94_vm0, %v89_v18, 0.0 }
  0x1c   :  { %v144_v52 = vadd.f32 %v143_v39, %v142_v40  ;;  %v127_v57 = vadd.f32 %v126_v38, %v125_v46  ;;  %v147_v58 = vsel %vm94_vm0, %v83_v1, 0.0  ;;  %v163_v60 = vadd.f32 %v162_v43, %v161_v48 }
  0x1d   :  { %v107_v56 = vadd.f32 %v106_v27, %v105_v45  ;;  %v92_v61 = vmul.f32 %v459_v30, %v52_v44  ;;  %v130_v62 = vsel %vm108_vm1, %v508_v59, 0.0  ;;  %v166_v55 = vsel %vm94_vm0, %v90_v19, 0.0 }
  0x1e   :  { %v146_v49 = vadd.f32 %v145_v47, %v144_v52  ;;  %v129_v0 = vadd.f32 %v128_v51, %v127_v57  ;;  %v149_v3 = vsel %vm94_vm0, %v84_v2, 0.0  ;;  %v165_v4 = vadd.f32 %v164_v53, %v163_v60  ;;  %v198_v57 = vld [vmem:[%s580_s4] sm:$0x3] }
  0x1f   :  { %v110_v63 = vadd.f32 %v109_v50, %v107_v56  ;;  %v93_v6 = vmul.f32 %v464_v31, %v53_v54  ;;  %v168_v8 = vsel %vm94_vm0, %v91_v24, 0.0  ;;  %v151_v30 = vsel %vm108_vm1, %v518_v5, 0.0 }
  0x20   :  { %v148_v7 = vadd.f32 %v147_v58, %v146_v49  ;;  %v131_v9 = vadd.f32 %v130_v62, %v129_v0  ;;  %v167_v10 = vadd.f32 %v166_v55, %v165_v4  ;;  %v170_v11 = vsel %vm94_vm0, %v92_v61, 0.0 }
  0x21   :  { %v111_v1 = vrot.slane %v110_v63, 4  ;;  %v172_v2 = vsel %vm108_vm1, %v93_v6, 0.0  ;;  %v181_v26 = vstv %s578_s2  ;;  %vm214_vm2 = vcmask 1041409  }
  0x22   :  { %v150_v59 = vadd.f32 %v149_v3, %v148_v7  ;;  %v132_v13 = vrot.slane %v131_v9, 4  ;;  %v169_v14 = vadd.f32 %v168_v8, %v167_v10  ;;  %vm216_vm3 = vcmask 1042434  }
  0x23   :  { %v112_v12 = vadd.f32 %v111_v1, %v110_v63  ;;  %vm218_vm4 = vcmask 1043459   ;;  %v200_v52 = vlaneseq }
  0x24   :  { %v152_v15 = vadd.f32 %v151_v30, %v150_v59  ;;  %v133_v31 = vadd.f32 %v132_v13, %v131_v9  ;;  %v171_v17 = vadd.f32 %v170_v11, %v169_v14 }
  0x25   :  { %v113_v16 = vrot.slane %v112_v12, 2  ;;  %v201_v53 = vshrl.u32 %v200_v52, 7 }
  0x26   :  { %v153_v18 = vrot.slane %v152_v15, 4  ;;  %v134_v22 = vrot.slane %v133_v31, 2  ;;  %v173_v23 = vadd.f32 %v172_v2, %v171_v17 }
  0x27   :  { %v114_v19 = vadd.f32 %v113_v16, %v112_v12  ;;  %v202_v54 = vsub.s32 0, %v201_v53  ;;  %v206_v56 = vsub.s32 1, %v201_v53 }
  0x28   :  { %v154_v24 = vadd.f32 %v153_v18, %v152_v15  ;;  %v135_v5 = vadd.f32 %v134_v22, %v133_v31  ;;  %v174_v20 = vrot.slane %v173_v23, 4 }
  0x29   :  { %v115_v25 = vrot.slane %v114_v19, 1  ;;  %v203_v58 = vrot.slane %v198_v57, %v202_v54  ;;  %v207_v60 = vrot.slane %v198_v57, %v206_v56 }
  0x2a   :  { %v155_v21 = vrot.slane %v154_v24, 2  ;;  %v136_v33 = vrot.slane %v135_v5, 1  ;;  %v175_v34 = vadd.f32 %v174_v20, %v173_v23 }
  0x2b   :  { %v116_v32 = vadd.f32 %v115_v25, %v114_v19 }
  0x2c   :  { %v156_v35 = vadd.f32 %v155_v21, %v154_v24  ;;  %v137_v27 = vadd.f32 %v136_v33, %v135_v5  ;;  %v176_v28 = vrot.slane %v175_v34, 2 }
  0x2d   :  { %v182_v36 = vadd.f32 %v181_v26, %v116_v32 }
  0x2e   :  { %v157_v29 = vrot.slane %v156_v35, 1  ;;  %v177_v37 = vadd.f32 %v176_v28, %v175_v34  ;;  %v183_v38 = vadd.f32 %v181_v26, %v137_v27 }
  0x2f   :  { %v186_v39 = vmax.f32 %v182_v36, 0.0 }
  0x30   :  { %v158_v40 = vadd.f32 %v157_v29, %v156_v35  ;;  %v178_v41 = vrot.slane %v177_v37, 1  ;;  %v187_v42 = vmax.f32 %v183_v38, 0.0 }
  0x32   :  { %v184_v43 = vadd.f32 %v181_v26, %v158_v40  ;;  %v179_v44 = vadd.f32 %v178_v41, %v177_v37  ;;  %v215_v45 = vsel %vm214_vm2, %v187_v42, %v186_v39 }
  0x34   :  { %v188_v46 = vmax.f32 %v184_v43, 0.0  ;;  %v185_v47 = vadd.f32 %v181_v26, %v179_v44 }
  0x36   :  { %v217_v48 = vsel %vm216_vm3, %v188_v46, %v215_v45  ;;  %v189_v50 = vmax.f32 %v185_v47, 0.0 }
  0x38   :  { %v219_v51 = vsel %vm218_vm4, %v189_v50, %v217_v48 }
  0x39   :  { %312 = vmatmul.mubr.msk.f32.vlgmr.msra.gmra.mxu0 %vm94_vm0, %v219_v51 }
  0xf9   :  { %v288_v61 = vpop.f32.mrf.mxu0 }
  0xfa   :  { %v289_v49 = vadd.f32 %v288_v61, %v203_v58 }
  0xfb   :  { %v290_v62 = vpop.f32.mrf.mxu0 }
  0xfc   :  { %v291_v55 = vadd.f32 %v290_v62, %v207_v60 }
  0xfe   :  { %v295_v63 = vcombine.low %v289_v49, %v291_v55 }
 0x100   :  { %297 = vst [vmem:[#allocation3] sm:$0xff] %v295_v63 }
 0x101   :  { %326 = shalt.err (!%p323_p4)
}
 0x102   :  { %307 = dma.vmem_to_hbm [thread:$0]  %s305_s12, 128, %s581_s5, [#allocation4]  }
 0x103   :  { %335 = dma.done.wait [#allocation4], 128  }
 0x104   :  { %336 = vsyncadd [#allocation4], 4294967168 }
 0x105   :  { %311 = vsyncpa [#allocation4], 1 }

</bundles_post_ra>
